<compile_context>
chip_gen: v6e
topology: v6e:2x2x1
jax: 0.10.0
libtpu: 0.0.40
codegen_flags: <defaults>
</compile_context>

<pallas_src>
import jax
import jax.numpy as jnp
from jax.experimental import pallas as pl
from jax.experimental.pallas import tpu as pltpu


def net_kernel(x_ref, p_ref, o_ref):
    """x_ref: (tile_b, n_states); p_ref: packed params (n_states+n_actions+2, hidden);
    o_ref: (tile_b, n_actions)."""
    n_states = x_ref.shape[1]
    n_actions = o_ref.shape[1]

    # Static views into the packed parameter slab (single DMA'd tile).
    w1 = p_ref[0:n_states, :]                       # (n_states, hidden)
    b1 = p_ref[n_states:n_states + 1, :]            # (1, hidden)

    # fc1 on the MXU + tanh on the EUP.
    h = jnp.tanh(
        jnp.dot(x_ref[...], w1, preferred_element_type=jnp.float32) + b1
    )                                               # (tile_b, hidden)

    # fc2 on VPU multiply + XLU lane-reduce (K=10, N=n_actions is far too small
    # to be worth a second MXU round-trip).
    cols = []
    for a in range(n_actions):                      # n_actions is tiny & static
        wa = p_ref[n_states + 1 + a:n_states + 2 + a, :]      # (1, hidden)
        cols.append(jnp.sum(h * wa, axis=-1, keepdims=True))  # (tile_b, 1)
    out = cols[0] if n_actions == 1 else jnp.concatenate(cols, axis=-1)

    b2 = p_ref[n_states + 1 + n_actions:n_states + 2 + n_actions, 0:n_actions]
    o_ref[...] = (out + b2).astype(o_ref.dtype)


def pack_params(w1, b1, w2, b2):
    """Pack PyTorch-layout params into one f32 slab. Call ONCE (hoisted out of
    the per-forward path).
      w1: (hidden, n_states)   b1: (hidden,)
      w2: (n_actions, hidden)  b2: (n_actions,)
    Layout (rows x hidden):
      [0:n_states]                       w1.T            (in, out)
      [n_states]                         b1
      [n_states+1 : n_states+1+n_act]    w2              (out, in)  -- row per action
      [n_states+1+n_act]                 b2 in lanes [0:n_actions]
    """
    hidden, n_states = w1.shape
    n_actions = w2.shape[0]
    rows = n_states + n_actions + 2
    p = jnp.zeros((rows, hidden), jnp.float32)
    p = p.at[0:n_states, :].set(jnp.transpose(w1).astype(jnp.float32))
    p = p.at[n_states, :].set(b1.astype(jnp.float32))
    p = p.at[n_states + 1:n_states + 1 + n_actions, :].set(w2.astype(jnp.float32))
    p = p.at[n_states + 1 + n_actions, 0:n_actions].set(b2.astype(jnp.float32))
    return p


def net_forward(x, packed, n_actions):
    """x: (B, n_states) f32; packed: pack_params(...) slab; returns (B, n_actions)."""
    B, n_states = x.shape
    hidden = packed.shape[1]

    # Pad batch to a sublane multiple; tile large batches so the grid axis can
    # shard across TensorCores (v7x) while staying a single step for small B.
    Bp = ((B + 7) // 8) * 8
    if Bp > 1024:
        tile_b = 512
        Bp = ((B + tile_b - 1) // tile_b) * tile_b
    else:
        tile_b = Bp
    if Bp != B:
        x = jnp.pad(x, ((0, Bp - B), (0, 0)))
    grid = (Bp // tile_b,)

    flops = 2 * Bp * hidden * (n_states + n_actions)
    bytes_accessed = 4 * (Bp * n_states + int(packed.size) + Bp * n_actions)

    out = pl.pallas_call(
        net_kernel,
        out_shape=jax.ShapeDtypeStruct((Bp, n_actions), jnp.float32),
        grid_spec=pltpu.PrefetchScalarGridSpec(
            num_scalar_prefetch=0,
            grid=grid,
            in_specs=[
                pl.BlockSpec((tile_b, n_states), lambda i: (i, 0)),
                pl.BlockSpec(packed.shape, lambda i: (0, 0)),  # params resident
            ],
            out_specs=pl.BlockSpec((tile_b, n_actions), lambda i: (i, 0)),
        ),
        compiler_params=pltpu.CompilerParams(
            dimension_semantics=("parallel",),
        ),
        cost_estimate=pl.CostEstimate(
            flops=flops,
            transcendentals=Bp * hidden,
            bytes_accessed=bytes_accessed,
        ),
    )(x, packed)
    return out[:B]


def init_params(key, n_states, n_actions, hidden=10):
    """Synthetic init mirroring the PyTorch module: weights ~ N(0, 0.3);
    biases ~ U(-1/sqrt(fan_in), 1/sqrt(fan_in)); logstd ~ N(0, 0.3) (unused)."""
    k1, k2, k3, k4, k5 = jax.random.split(key, 5)
    w1 = 0.3 * jax.random.normal(k1, (hidden, n_states), jnp.float32)   # (out, in)
    b1 = jax.random.uniform(k2, (hidden,), jnp.float32,
                            -1.0 / jnp.sqrt(n_states), 1.0 / jnp.sqrt(n_states))
    w2 = 0.3 * jax.random.normal(k3, (n_actions, hidden), jnp.float32)  # (out, in)
    b2 = jax.random.uniform(k4, (n_actions,), jnp.float32,
                            -1.0 / jnp.sqrt(hidden), 1.0 / jnp.sqrt(hidden))
    logstd = 0.3 * jax.random.normal(k5, (n_actions,), jnp.float32)     # unused in forward
    return w1, b1, w2, b2, logstd


if __name__ == "__main__":
    # Small continuous-control shapes (Pendulum-ish): 3 obs dims, 1 action dim.
    B, N_STATES, N_ACTIONS, HIDDEN = 4, 3, 1, 10

    key = jax.random.PRNGKey(0)
    kx, kp = jax.random.split(key)
    x = jax.random.normal(kx, (B, N_STATES), jnp.float32)
    w1, b1, w2, b2, _logstd = init_params(kp, N_STATES, N_ACTIONS, HIDDEN)

    # Parameter packing is done ONCE, outside the forward path.
    packed = pack_params(w1, b1, w2, b2)

    out = net_forward(x, packed, N_ACTIONS)
    out = jax.block_until_ready(out)

    # Pure-JAX reference of the same semantics (PyTorch Linear: x @ W.T + b).
    ref = jnp.tanh(x @ w1.T + b1) @ w2.T + b2
    assert out.shape == (B, N_ACTIONS)
    assert jnp.allclose(out, ref, atol=1e-5, rtol=1e-5), (out, ref)

    print("KERNEL_OK")
</pallas_src>

<mosaic_0001>
module attributes {stable_mosaic.version = 11 : i64} {
  func.func @net_kernel(%arg0: i32, %arg1: memref<8x3xf32, #tpu.memory_space<vmem>>, %arg2: memref<6x10xf32, #tpu.memory_space<vmem>>, %arg3: memref<8x1xf32, #tpu.memory_space<vmem>>) attributes {dimension_semantics = [#tpu.dimension_semantics<parallel>], iteration_bounds = array<i64: 1>, scalar_prefetch = 0 : i64, scratch_operands = 0 : i64, tpu.core_type = #tpu.core_type<tc>, window_params = [{transform_indices = @transform_0, window_bounds = array<i64: 8, 3>}, {pipeline_mode = #tpu.pipeline_mode<synchronous>, transform_indices = @transform_1, window_bounds = array<i64: 6, 10>}, {transform_indices = @transform_2, window_bounds = array<i64: 8, 1>}]} {
    %c0 = arith.constant 0 : index
    %c0_0 = arith.constant 0 : index
    %0 = vector.load %arg2[%c0, %c0_0] : memref<6x10xf32, #tpu.memory_space<vmem>>, vector<3x10xf32>
    %c3 = arith.constant 3 : index
    %c0_1 = arith.constant 0 : index
    %1 = vector.load %arg2[%c3, %c0_1] : memref<6x10xf32, #tpu.memory_space<vmem>>, vector<1x10xf32>
    %c0_2 = arith.constant 0 : index
    %c0_3 = arith.constant 0 : index
    %2 = vector.load %arg1[%c0_2, %c0_3] : memref<8x3xf32, #tpu.memory_space<vmem>>, vector<8x3xf32>
    %cst = arith.constant dense<0.000000e+00> : vector<8x10xf32>
    %3 = tpu.matmul %2, %0, %cst {dimension_numbers = #tpu.dot_dimension_numbers<[1], [0], [0], [1], [0, 0, 1, 1], [], []>} : vector<8x3xf32>, vector<3x10xf32>, vector<8x10xf32> -> vector<8x10xf32>
    %4 = vector.broadcast %1 : vector<1x10xf32> to vector<8x10xf32>
    %5 = arith.addf %3, %4 : vector<8x10xf32>
    %6 = math.tanh %5 : vector<8x10xf32>
    %c4 = arith.constant 4 : index
    %c0_4 = arith.constant 0 : index
    %7 = vector.load %arg2[%c4, %c0_4] : memref<6x10xf32, #tpu.memory_space<vmem>>, vector<1x10xf32>
    %8 = vector.broadcast %7 : vector<1x10xf32> to vector<8x10xf32>
    %9 = arith.mulf %6, %8 : vector<8x10xf32>
    %cst_5 = arith.constant dense<0.000000e+00> : vector<8xf32>
    %10 = vector.multi_reduction <add>, %9, %cst_5 [1] : vector<8x10xf32> to vector<8xf32>
    %11 = vector.shape_cast %10 : vector<8xf32> to vector<8x1xf32>
    %c5 = arith.constant 5 : index
    %c0_6 = arith.constant 0 : index
    %12 = vector.load %arg2[%c5, %c0_6] : memref<6x10xf32, #tpu.memory_space<vmem>>, vector<1x1xf32>
    %13 = vector.broadcast %12 : vector<1x1xf32> to vector<8x1xf32>
    %14 = arith.addf %11, %13 : vector<8x1xf32>
    %c0_7 = arith.constant 0 : index
    %c0_8 = arith.constant 0 : index
    %15 = vector.load %arg3[%c0_7, %c0_8] : memref<8x1xf32, #tpu.memory_space<vmem>>, vector<8x1xf32>
    tpu.vector_store %arg3[%c0_7, %c0_8], %14 {strides = array<i32>} : memref<8x1xf32, #tpu.memory_space<vmem>>, vector<8x1xf32>,
    return
  }
  func.func @transform_0(%arg0: i32) -> (i32, i32) {
    %c0_i32 = arith.constant 0 : i32
    %c0_i32_0 = arith.constant 0 : i32
    return %arg0, %c0_i32 : i32, i32
  }
  func.func @transform_1(%arg0: i32) -> (i32, i32) {
    %c0_i32 = arith.constant 0 : i32
    %c0_i32_0 = arith.constant 0 : i32
    %c0_i32_1 = arith.constant 0 : i32
    return %c0_i32, %c0_i32_0 : i32, i32
  }
  func.func @transform_2(%arg0: i32) -> (i32, i32) {
    %c0_i32 = arith.constant 0 : i32
    %c0_i32_0 = arith.constant 0 : i32
    return %arg0, %c0_i32 : i32, i32
  }
}

</mosaic_0001>

<bundles_post_ra>
// kernel: tpu_custom_call.1
= control target key start
LH: loop header
LB: loop body
LE: loop exit
PB: predicated region body
PF: predicated region fallthrough
CT: control target
= control target key end

     0   :  { %vm22_vm0 = vcmask 1042432   ;;  %vm18_vm1 = vcmask 23552   ;;  %v135_v0 = vmov 0.0   ;;  %vm136_vm2 = vmmov 0   ;;  %s170_s1 = inlined_call_operand.vmem [shape: f32[6,10], index: 1, kind: input, shape index: {}]   ;;  %s171_s0 = inlined_call_operand.vmem [shape: f32[8,3], index: 0, kind: input, shape index: {}]   ;;  %s172_s2 = inlined_call_operand.vmem [shape: f32[8,1], index: 2, kind: output, shape index: {}]  }
   0x1   :  { %126 = vmatprep.subr.mxu0 %v135_v0  ;;  %v11_v1 = vld [vmem:[%s170_s1] sm:$0x7]  ;;  %128 = vmatprep.mubr.msk.f32.mxu0 %vm136_vm2, %v135_v0  ;;  %v119_v3 = vld [vmem:[%s170_s1 + $0x3] ss:$0 sm:$0xff]  ;;  %v122_v7 = vld [vmem:[%s170_s1 + $0x4] ss:$0 sm:$0xff] }
   0x2   :  { %v13_v2 = vld [vmem:[%s171_s0] sm:$0xff]  ;;  %127 = vmatpush3.msk.msra.mxu0 %vm22_vm0, %v11_v1  ;;  %vm103_vm3 = vcmask 80896   ;;  %vm113_vm4 = vcmask 7168  }
   0x3   :  { %129 = vmatmul.mubr.msk.f32.vlgmr.msra.gmra.mxu0 %vm18_vm1, %v13_v2  ;;  %v123_v11 = vld [vmem:[%s170_s1 + $0x5] ss:$0 sm:$0xff] }
  0xc3   :  { %v92_v4 = vpop.f32.mrf.mxu0 }
  0xc4   :  { %v93_v5 = vadd.f32 %v119_v3, %v92_v4 }
  0xc5   :  { %v130_v6 = vpop.f32.mrf.mxu0 }
  0xc6   :  { %133 = vtanh.f32 %v93_v5 }
  0xd3   :  { %v134_v8 = vpop.eup %133 }
  0xd4   :  { %v102_v9 = vmul.f32 %v134_v8, %v122_v7 }
  0xd6   :  { %v104_v10 = vsel %vm103_vm3, %v102_v9, 0.0 }
  0xd7   :  { %105 = vadd.xlane.f32.xlu0 %v104_v10 }
 0x160   :  { %v106_v12 = vpop.xlane.xlu0 %105 }
 0x161   :  { %v112_v13 = vadd.f32 %v123_v11, %v106_v12 }
 0x163   :  { %114 = vst.msk [vmem:[%s172_s2] sm:$0xff] %vm113_vm4, %v112_v13 }

</bundles_post_ra>
